<compile_context>
chip_gen: v6e
topology: v6e:2x2x1
jax: 0.10.0
libtpu: 0.0.40
codegen_flags: <defaults>
</compile_context>

<pallas_src>
import functools
import math

import jax
import jax.numpy as jnp
from jax import lax
from jax.experimental import pallas as pl
from jax.experimental.pallas import tpu as pltpu


def _round_up(x, m):
    return ((x + m - 1) // m) * m


# ----------------------------------------------------------------------------
# Pallas kernel 1: Linear layer (y = x @ W.T + b), tiled over rows (M axis).
# ----------------------------------------------------------------------------
def _linear_kernel(x_ref, wt_ref, b_ref, o_ref):
    o_ref[...] = (
        jnp.dot(x_ref[...], wt_ref[...], preferred_element_type=jnp.float32)
        + b_ref[...]  # [1, out] broadcasts over rows
    )


def pallas_linear(x, W, b=None, tile_m=512):
    """x: [M, in], W: [out, in] (torch convention), b: [out] or None -> [M, out] f32."""
    x = x.astype(jnp.float32)
    M, K = x.shape
    Dout = W.shape[0]
    wt = W.T.astype(jnp.float32)
    b2 = (jnp.zeros((1, Dout), jnp.float32) if b is None
          else b.reshape(1, Dout).astype(jnp.float32))

    TM = min(tile_m, _round_up(M, 8))
    Mp = _round_up(M, TM)
    if Mp != M:
        x = jnp.pad(x, ((0, Mp - M), (0, 0)))

    out = pl.pallas_call(
        _linear_kernel,
        out_shape=jax.ShapeDtypeStruct((Mp, Dout), jnp.float32),
        grid=(Mp // TM,),
        in_specs=[
            pl.BlockSpec((TM, K), lambda i: (i, 0)),
            pl.BlockSpec((K, Dout), lambda i: (0, 0)),
            pl.BlockSpec((1, Dout), lambda i: (0, 0)),
        ],
        out_specs=pl.BlockSpec((TM, Dout), lambda i: (i, 0)),
        compiler_params=pltpu.CompilerParams(dimension_semantics=("parallel",)),
    )(x, wt, b2)
    return out[:M]


# ----------------------------------------------------------------------------
# Pallas kernel 2: relation-structured masked graph attention
# (TransformerConv message + aggregation + skip), all heads per grid step,
# tiled over destination nodes, lane-dense [Np, 4D] inputs / [Np, D] output.
# ----------------------------------------------------------------------------
def _attn_kernel(qs_ref, kv_ref, er_ref, rel_ref, o_ref, *, H, C, D, R):
    # ---- per-grid-step (head-independent) precompute ----
    rel = rel_ref[...]                                      # [TND, Ns] int32, -1 = no edge
    mask = (rel >= 0).astype(jnp.float32)                   # 1.0 where edge j->i exists
    bias = (mask - 1.0) * jnp.float32(1e30)                 # 0 on edges, -1e30 elsewhere
    # Relation one-hot indicators: computed ONCE and reused across all heads
    # in BOTH the score loop and the per-relation alpha-sum loop.
    ind = [(rel == r).astype(jnp.float32) for r in range(R)]
    ones_col = jnp.ones((kv_ref.shape[0], 1), jnp.float32)  # for MXU row-sum contraction

    for h in range(H):                                      # H small & static -> unrolled
        lo, hi = h * C, (h + 1) * C
        q = qs_ref[:, lo:hi]                                 # [TND, C] (pre-scaled by 1/sqrt(C))
        k = kv_ref[:, D + lo:D + hi]                         # [Ns, C]
        v = kv_ref[:, 2 * D + lo:2 * D + hi]                 # [Ns, C]
        er = er_ref[:, lo:hi]                                # [R, C] projected relation embeddings

        # scores[i, j] = q_i . (k_j + e_rel(i,j))   (q already carries 1/sqrt(C))
        qk = lax.dot_general(q, k, (((1,), (1,)), ((), ())),
                             preferred_element_type=jnp.float32)   # [TND, Ns] (MXU)
        qe = lax.dot_general(q, er, (((1,), (1,)), ((), ())),
                             preferred_element_type=jnp.float32)   # [TND, R]  (MXU)

        s = qk + bias                                        # additive mask bias
        for r in range(R):                                   # reuse hoisted indicators
            s = s + ind[r] * qe[:, r:r + 1]

        row_max = jnp.max(s, axis=-1, keepdims=True)
        p = jnp.exp(s - row_max) * mask                      # keep *mask: isolated dst rows -> 0
        denom = jnp.sum(p, axis=-1, keepdims=True)
        inv = pl.reciprocal(jnp.where(denom > 0, denom, jnp.float32(1.0)), approx=True)
        alpha = p * inv

        # out_i = sum_j alpha_ij * (v_j + e_rel(i,j))
        out_h = jnp.dot(alpha, v, preferred_element_type=jnp.float32)   # [TND, C] (MXU)
        for r in range(R):
            # Row-sum of alpha over relation-r edges as an MXU ones-column contraction
            # (off the XLU), then a tiny [TND,1] x [1,C] broadcast MAC.
            a_col = jnp.dot(alpha * ind[r], ones_col,
                            preferred_element_type=jnp.float32)          # [TND, 1]
            out_h = out_h + a_col * er[r:r + 1, :]

        # Direct lane-slice write: head output + skip (columns 3D:4D of the dst tile).
        o_ref[:, lo:hi] = out_h + qs_ref[:, 3 * D + lo:3 * D + hi]


def pallas_graph_attention(qkvs, erel, rel, *, H, C, D, R, tile_nd):
    """qkvs: [Np, 4D] (q|k|v|skip, lane-dense); erel: [R, D]; rel: [Np, Np] int32."""
    Np = qkvs.shape[0]
    TND = tile_nd
    assert Np % TND == 0

    kern = functools.partial(_attn_kernel, H=H, C=C, D=D, R=R)
    return pl.pallas_call(
        kern,
        out_shape=jax.ShapeDtypeStruct((Np, D), jnp.float32),
        grid=(Np // TND,),
        in_specs=[
            pl.BlockSpec((TND, 4 * D), lambda i: (i, 0)),   # q + skip (dst tile, lane-dense)
            pl.BlockSpec((Np, 4 * D), lambda i: (0, 0)),    # k + v (all sources, resident)
            pl.BlockSpec((R, D), lambda i: (0, 0)),         # projected relation embeddings
            pl.BlockSpec((TND, Np), lambda i: (i, 0)),      # relation ids (int32, -1 = no edge)
        ],
        out_specs=pl.BlockSpec((TND, D), lambda i: (i, 0)),
        compiler_params=pltpu.CompilerParams(
            dimension_semantics=("parallel",),
            vmem_limit_bytes=64 * 1024 * 1024),
    )(qkvs, qkvs, erel, rel)


# ----------------------------------------------------------------------------
# Model: KGCodeReassign (deterministic synthetic parameters).
# ----------------------------------------------------------------------------
class KGCodeReassignPallas:
    NUM_RELATIONS = 11

    def __init__(self, args, edges_dict, c2ind, cm2ind, key):
        self.c2ind = dict(c2ind)
        self.cm2ind = dict(cm2ind)
        self.original_code_num = len(c2ind)

        src, dst, etype = [], [], []
        for pair, relid in edges_dict.items():
            if relid != 0:
                src.append(self.cm2ind[pair[0]] + self.original_code_num)
                dst.append(self.c2ind[pair[1]])
            else:
                src.append(self.c2ind[pair[0]])
                dst.append(self.c2ind[pair[1]])
            etype.append(relid)
        self.edges = jnp.array([src, dst], dtype=jnp.int32)       # [2, E]
        self.edges_type = jnp.array(etype, dtype=jnp.int32)       # [E]

        D = args['attention_dim']
        H = args['use_multihead']
        C = D // H
        assert C * H == D, "attention_dim must be divisible by use_multihead"
        edge_dim = args['edge_dim']
        self.D, self.H, self.C, self.edge_dim = D, H, C, edge_dim
        R = self.NUM_RELATIONS

        # Deterministic parameter init (synthetic; not a checkpoint load).
        ks = jax.random.split(key, 9)
        s = 0.1
        self.edge_emb = s * jax.random.normal(ks[0], (R, edge_dim), jnp.float32)
        Wq = s * jax.random.normal(ks[1], (D, D), jnp.float32)
        bq = s * jax.random.normal(ks[2], (D,), jnp.float32)
        Wk = s * jax.random.normal(ks[3], (D, D), jnp.float32)
        bk = s * jax.random.normal(ks[4], (D,), jnp.float32)
        Wv = s * jax.random.normal(ks[5], (D, D), jnp.float32)
        bv = s * jax.random.normal(ks[6], (D,), jnp.float32)
        self.We = s * jax.random.normal(ks[7], (D, edge_dim), jnp.float32)   # lin_edge, no bias
        Ws = s * jax.random.normal(ks[8], (D, D), jnp.float32)               # lin_skip, no bias
        # hidden*heads == attention_dim  ->  no project_layer in RGAT.

        # Fold the 1/sqrt(C) attention scale into the q projection (free on host).
        scale = 1.0 / math.sqrt(C)
        Wq = Wq * scale
        bq = bq * scale

        # Fused q/k/v/skip projection: one lane-dense [N, 4D] matmul.
        self.Wqkvs = jnp.concatenate([Wq, Wk, Wv, Ws], axis=0)               # [4D, D]
        self.bqkvs = jnp.concatenate([bq, bk, bv, jnp.zeros((D,), jnp.float32)])

        # Pre-project the 11 relation embeddings through lin_edge (E_rel = emb @ We.T).
        self.erel = pallas_linear(self.edge_emb, self.We, None)              # [R, D] lane-dense

        # Fixed node count: forward always concatenates all codes + mcodes.
        N = len(c2ind) + len(cm2ind)
        Np = _round_up(N, 8)
        if Np >= 256:
            Np = _round_up(Np, 128)
        # Destination tile: multiple of 8, divides Np, <= 128, and >= 2 grid steps
        # when possible (keeps both v7x TensorCores busy under "parallel" semantics).
        TND = Np
        if Np >= 16:
            start = (min(128, Np // 2) // 8) * 8
            for cand in range(start, 7, -8):
                if Np % cand == 0:
                    TND = cand
                    break
        self.N, self.Np, self.TND = N, Np, TND

        # Single dense int32 relation-id matrix, -1 = no edge (mask derived in-kernel).
        # Note: edges_dict is keyed by (src, dst), so there is at most one edge per
        # ordered pair -> the scatter cannot drop parallel edges.
        d, sidx = self.edges[1], self.edges[0]
        self.rel_pad = jnp.full((Np, Np), -1, jnp.int32).at[d, sidx].set(self.edges_type)

    def _forward_single(self, x):
        """x: [N, D] node features (codes then mcodes). Returns [N, D]."""
        D, N, Np = self.D, self.N, self.Np

        x = x.astype(jnp.float32)
        if Np != N:
            x = jnp.pad(x, ((0, Np - N), (0, 0)))

        # Fused q/k/v/skip projection (single 128-lane-wide matmul); the [Np, 4D]
        # result is fed straight into the attention kernel (no slicing/transpose).
        qkvs = pallas_linear(x, self.Wqkvs, self.bqkvs)           # [Np, 4D]

        out = pallas_graph_attention(
            qkvs, self.erel, self.rel_pad,
            H=self.H, C=self.C, D=D, R=self.NUM_RELATIONS,
            tile_nd=self.TND)                                     # [Np, D] lane-dense

        return out[:N]

    def __call__(self, code_embeddings, mcode_embeddings, indices=None):
        if indices is not None:
            # TODO(synk): subgraph(indices, ...) relabeling path not implemented.
            raise NotImplementedError("indices-based subgraph extraction not supported")
        if code_embeddings.ndim == 2:
            x = jnp.concatenate([code_embeddings, mcode_embeddings], axis=0)
            g = self._forward_single(x)
            return g[: code_embeddings.shape[0]]
        else:
            xb = jnp.concatenate([code_embeddings, mcode_embeddings], axis=1)  # [B, N, D]
            g = jax.vmap(self._forward_single)(xb)                             # batched
            return g[:, : code_embeddings.shape[1]]


# ----------------------------------------------------------------------------
# Demo
# ----------------------------------------------------------------------------
if __name__ == "__main__":
    D = 32          # attention_dim
    heads = 4       # use_multihead  -> per-head C = 8
    edge_dim = 16
    n_codes = 12
    n_mcodes = 4

    c2ind = {f"c{i}": i for i in range(n_codes)}
    cm2ind = {f"m{i}": i for i in range(n_mcodes)}

    # Synthetic knowledge-graph edges.
    edges_dict = {}
    for i in range(n_codes):                       # code -> code edges, relation 0
        edges_dict[(f"c{i}", f"c{(i + 1) % n_codes}")] = 0
    t = 0
    for i in range(n_mcodes):                      # mcode -> code edges, relations 1..10
        for j in range(0, n_codes, 3):
            edges_dict[(f"m{i}", f"c{j}")] = (t % 10) + 1
            t += 1

    args = {'attention_dim': D, 'use_multihead': heads,
            'edge_dim': edge_dim, 'rep_dropout': 0.2}

    key = jax.random.PRNGKey(0)
    kp, k1, k2 = jax.random.split(key, 3)
    model = KGCodeReassignPallas(args, edges_dict, c2ind, cm2ind, kp)

    code_embeddings = jax.random.normal(k1, (n_codes, D), jnp.float32)
    mcode_embeddings = jax.random.normal(k2, (n_mcodes, D), jnp.float32)

    out = model(code_embeddings, mcode_embeddings, indices=None)
    out = jax.block_until_ready(out)

    assert out.shape == (n_codes, D), out.shape
    assert bool(jnp.all(jnp.isfinite(out)))
    print("KERNEL_OK")
</pallas_src>

<mosaic_0001>
module attributes {stable_mosaic.version = 11 : i64} {
  func.func @_linear_kernel(%arg0: i32, %arg1: memref<16x16xf32, #tpu.memory_space<vmem>>, %arg2: memref<16x32xf32, #tpu.memory_space<vmem>>, %arg3: memref<1x32xf32, #tpu.memory_space<vmem>>, %arg4: memref<16x32xf32, #tpu.memory_space<vmem>>) attributes {dimension_semantics = [#tpu.dimension_semantics<parallel>], iteration_bounds = array<i64: 1>, scalar_prefetch = 0 : i64, scratch_operands = 0 : i64, tpu.core_type = #tpu.core_type<tc>, window_params = [{transform_indices = @transform_0, window_bounds = array<i64: 16, 16>}, {pipeline_mode = #tpu.pipeline_mode<synchronous>, transform_indices = @transform_1, window_bounds = array<i64: 16, 32>}, {pipeline_mode = #tpu.pipeline_mode<synchronous>, transform_indices = @transform_2, window_bounds = array<i64: 1, 32>}, {transform_indices = @transform_3, window_bounds = array<i64: 16, 32>}]} {
    %c0 = arith.constant 0 : index
    %c0_0 = arith.constant 0 : index
    %0 = vector.load %arg1[%c0, %c0_0] : memref<16x16xf32, #tpu.memory_space<vmem>>, vector<16x16xf32>
    %c0_1 = arith.constant 0 : index
    %c0_2 = arith.constant 0 : index
    %1 = vector.load %arg2[%c0_1, %c0_2] : memref<16x32xf32, #tpu.memory_space<vmem>>, vector<16x32xf32>
    %cst = arith.constant dense<0.000000e+00> : vector<16x32xf32>
    %2 = tpu.matmul %0, %1, %cst {dimension_numbers = #tpu.dot_dimension_numbers<[1], [0], [0], [1], [0, 0, 1, 1], [], []>} : vector<16x16xf32>, vector<16x32xf32>, vector<16x32xf32> -> vector<16x32xf32>
    %c0_3 = arith.constant 0 : index
    %c0_4 = arith.constant 0 : index
    %3 = vector.load %arg3[%c0_3, %c0_4] : memref<1x32xf32, #tpu.memory_space<vmem>>, vector<1x32xf32>
    %4 = vector.broadcast %3 : vector<1x32xf32> to vector<16x32xf32>
    %5 = arith.addf %2, %4 : vector<16x32xf32>
    %c0_5 = arith.constant 0 : index
    %c0_6 = arith.constant 0 : index
    %6 = vector.load %arg4[%c0_5, %c0_6] : memref<16x32xf32, #tpu.memory_space<vmem>>, vector<16x32xf32>
    tpu.vector_store %arg4[%c0_5, %c0_6], %5 {strides = array<i32>} : memref<16x32xf32, #tpu.memory_space<vmem>>, vector<16x32xf32>,
    return
  }
  func.func @transform_0(%arg0: i32) -> (i32, i32) {
    %c0_i32 = arith.constant 0 : i32
    %c0_i32_0 = arith.constant 0 : i32
    return %arg0, %c0_i32 : i32, i32
  }
  func.func @transform_1(%arg0: i32) -> (i32, i32) {
    %c0_i32 = arith.constant 0 : i32
    %c0_i32_0 = arith.constant 0 : i32
    %c0_i32_1 = arith.constant 0 : i32
    return %c0_i32, %c0_i32_0 : i32, i32
  }
  func.func @transform_2(%arg0: i32) -> (i32, i32) {
    %c0_i32 = arith.constant 0 : i32
    %c0_i32_0 = arith.constant 0 : i32
    %c0_i32_1 = arith.constant 0 : i32
    return %c0_i32, %c0_i32_0 : i32, i32
  }
  func.func @transform_3(%arg0: i32) -> (i32, i32) {
    %c0_i32 = arith.constant 0 : i32
    %c0_i32_0 = arith.constant 0 : i32
    return %arg0, %c0_i32 : i32, i32
  }
}

</mosaic_0001>

<bundles_post_ra>
// kernel: tpu_custom_call.1
= control target key start
LH: loop header
LB: loop body
LE: loop exit
PB: predicated region body
PF: predicated region fallthrough
CT: control target
= control target key end

     0   :  { %8 = vsyncpa [#allocation3], 0  ;;  %s288_s0 = inlined_call_operand.hbm [shape: f32[16,16], index: 0, kind: input, shape index: {}]   ;;  %s289_s1 = inlined_call_operand.hbm [shape: f32[16,32], index: 1, kind: input, shape index: {}]   ;;  %s290_s2 = inlined_call_operand.vmem [shape: f32[1,32], index: 2, kind: input, shape index: {}]   ;;  %s291_s3 = inlined_call_operand.hbm [shape: f32[16,32], index: 3, kind: output, shape index: {}]  }
   0x1   :  { %9 = vsyncpa [#allocation6], 0 }
   0x2   :  { %10 = vsyncpa [#allocation4], 0  ;;  %s242_s12 = smov [#allocation2]  }
   0x3   :  { %s16_s13 = sshll.u32 %s242_s12, 4  ;;  %s17_s13 = int_to_ptr.vmem [resolvable:$true] %s16_s13 }
   0x4   :  { %s184_s14 = scalar_lea.vmem %s17_s13, 256  ;;  %p189_p1 = scmp.lt.s32.totalorder %s17_s13, %s17_s13 }
   0x5   :  { %p185_p0 = scmp.ne.s32.totalorder %s17_s13, %s184_s14  ;;  %p190_p2 = scmp.lt.s32.totalorder %s184_s14, %s184_s14 }
   0x7   :  { %p191_p3 = por %p190_p2, %p189_p1 }
   0x9   :  { %p192_p4 = pnand %p191_p3, %p185_p0 }
   0xb   :  { %195 = shalt.err (!%p192_p4)
}
   0xc   :  { %s243_s15 = smov 128   ;;  %s244_s16 = smov 8  }
   0xd   :  { %22 = dma.hbm_to_vmem [thread:$0]  %s288_s0, 256, %s17_s13, [#allocation3], %s243_s15, %s243_s15, %s244_s16  }
   0xe   :  { %s245_s19 = smov [#allocation5]  }
   0xf   :  { %s28_s20 = sshll.u32 %s245_s19, 4  ;;  %s29_s20 = int_to_ptr.vmem [resolvable:$true] %s28_s20 }
  0x10   :  { %s204_s21 = scalar_lea.vmem %s29_s20, 256  ;;  %p209_p6 = scmp.lt.s32.totalorder %s29_s20, %s29_s20 }
  0x11   :  { %p205_p5 = scmp.ne.s32.totalorder %s29_s20, %s204_s21  ;;  %p210_p7 = scmp.lt.s32.totalorder %s204_s21, %s204_s21 }
  0x13   :  { %p211_p8 = por %p210_p7, %p209_p6 }
  0x15   :  { %p212_p9 = pnand %p211_p8, %p205_p5 }
  0x17   :  { %215 = shalt.err (!%p212_p9)
}
  0x18   :  { %34 = dma.hbm_to_vmem [thread:$0]  %s289_s1, 256, %s29_s20, [#allocation6], %s243_s15, %s243_s15, %s244_s16  }
  0x19   :  { %236 = dma.done.wait [#allocation3], 256  }
  0x1a   :  { %237 = vsyncadd [#allocation3], 4294967040 }
  0x1b   :  { %238 = dma.done.wait [#allocation6], 256  }
  0x1c   :  { %239 = vsyncadd [#allocation6], 4294967040  ;;  %vm54_vm0 = vcmask 130048   ;;  %v46_v0 = vld [vmem:[#allocation5 + $0x8] sm:$0xff]  ;;  %v45_v1 = vld [vmem:[#allocation5] sm:$0xff]  ;;  %vm136_vm1 = vcmask 261120  }
  0x1d   :  { %v43_v2 = vld [vmem:[#allocation2] sm:$0xff]  ;;  %164 = vmatprep.subr.mxu0 %v46_v0  ;;  %v44_v3 = vld [vmem:[#allocation2 + $0x8] sm:$0xff]  ;;  %s246_s1 = smov [#allocation7]  }
  0x1e   :  { %168 = vmatprep.mubr.msk.f32.mxu0 %vm54_vm0, %v43_v2  ;;  %165 = vmatpush3.msra.mxu0 %v46_v0  ;;  %v157_v4 = vld [vmem:[%s290_s2] ss:$0 sm:$0xff]  ;;  %s144_s25 = sshll.u32 %s246_s1, 4  ;;  %s145_s25 = int_to_ptr.vmem [resolvable:$true] %s144_s25 }
  0x1f   :  { %166 = vmatprep.subr.mxu0 %v45_v1  ;;  %s216_s26 = scalar_lea.vmem %s145_s25, 256  ;;  %p221_p11 = scmp.lt.s32.totalorder %s145_s25, %s145_s25 }
  0x20   :  { %167 = vmatpush3.msra.mxu0 %v45_v1  ;;  %p217_p10 = scmp.ne.s32.totalorder %s145_s25, %s216_s26  ;;  %p222_p12 = scmp.lt.s32.totalorder %s216_s26, %s216_s26 }
  0x21   :  { %169 = vmatmul.mubr.msk.f32.vlgmr.msra.gmra.mxu0 %vm54_vm0, %v44_v3 }
  0x22   :  { %p223_p13 = por %p222_p12, %p221_p11 }
  0x24   :  { %p224_p0 = pnand %p223_p13, %p217_p10 }
  0xe1   :  { %v170_v5 = vpop.f32.mrf.mxu0 }
  0xe2   :  { %v133_v6 = vadd.f32 %v170_v5, %v157_v4 }
  0xe3   :  { %v127_v7 = vpop.f32.mrf.mxu0 }
  0xe4   :  { %v128_v8 = vadd.f32 %v157_v4, %v127_v7  ;;  %138 = vst.msk [vmem:[#allocation7 + $0x8] sm:$0xff] %vm136_vm1, %v133_v6 }
  0xe6   :  { %137 = vst.msk [vmem:[#allocation7] sm:$0xff] %vm136_vm1, %v128_v8 }
  0xe7   :  { %227 = shalt.err (!%p224_p0)
}
  0xe8   :  { %150 = dma.vmem_to_hbm [thread:$0]  %s145_s25, 256, %s291_s3, [#allocation4], %s243_s15, %s243_s15, %s244_s16  }
  0xe9   :  { %240 = dma.done.wait [#allocation4], 256  }
  0xea   :  { %241 = vsyncadd [#allocation4], 4294967040 }
  0xeb   :  { %154 = vsyncpa [#allocation3], 1 }
  0xec   :  { %155 = vsyncpa [#allocation6], 1 }
  0xed   :  { %156 = vsyncpa [#allocation4], 1 }

</bundles_post_ra>
